<compile_context>
chip_gen: v7x
topology: tpu7x:2x2x1
jax: 0.10.0
libtpu: 0.0.40
codegen_flags: <defaults>
</compile_context>

<pallas_src>
import functools

import jax
import jax.numpy as jnp
from jax.experimental import pallas as pl
from jax.experimental.pallas import tpu as pltpu

_EPS = 1e-10


def _gumbel_softmax_kernel(*refs, training, hard):
    if training:
        logits_ref, u_ref, out_ref = refs
    else:
        logits_ref, out_ref = refs
        u_ref = None

    x = logits_ref[...].astype(jnp.float32)  # temperature == 1 in forward()

    if training:
        u = u_ref[...].astype(jnp.float32)
        # w = exp(-g)  where  g = -log(eps - log(u + eps))  is the Gumbel noise.
        w = _EPS - jnp.log(u + _EPS)

    if hard:
        # one_hot(argmax(softmax(z))) == one_hot(argmax(z)); skip exp/sum/div.
        if training:
            z = x - jnp.log(w)          # z = x + g  (noise added when training)
        else:
            z = x
        c = z.shape[-1]
        iota = jax.lax.broadcasted_iota(jnp.int32, z.shape, dimension=1)
        m = jnp.max(z, axis=-1, keepdims=True)
        # first-index-wins argmax, like torch.max(dim=1)
        idx = jnp.min(jnp.where(z == m, iota, c), axis=-1, keepdims=True)
        out = jnp.where(iota == idx, 1.0, 0.0)
    else:
        # soft path only occurs when training (noise always present here).
        e = jnp.exp(x - jnp.max(x, axis=-1, keepdims=True))
        e = e * pl.reciprocal(w, approx=True)       # == exp(x - max_x + g)
        out = e * pl.reciprocal(jnp.sum(e, axis=-1, keepdims=True), approx=True)

    out_ref[...] = out.astype(out_ref.dtype)


def _pick_block_rows(batch, n_class):
    """Rows per block: multiple of 8, sized to ~1 MiB of f32 per block so
    double-buffered input + noise + output fit v5e's 16 MiB scoped VMEM and
    v7x's smaller VMEM without touching vmem_limit_bytes."""
    target_elems = 256 * 1024            # ~1 MiB of f32 per buffered block
    rows = max(8, ((target_elems // max(n_class, 1)) // 8) * 8)
    return min(batch, rows)


def gumbel_softmax_forward(logits, *, key=None, training=False, force_hard=False):
    """Mirrors GumbelSoftmax.forward(logits, temp=1, force_hard=...)."""
    hard = not (training and not force_hard)
    B, C = logits.shape
    tb = _pick_block_rows(B, C)
    grid = (pl.cdiv(B, tb),)

    # NOTE: C is kept as the full (lane) block dim; for lane-dense stores C
    # should ideally be a multiple of 128 (true for the demo: C == 128).
    blk = pl.BlockSpec((tb, C), lambda i: (i, 0))

    args = [logits]
    in_specs = [blk]
    if training:
        if key is None:
            key = jax.random.PRNGKey(0)
        # u ~ U[0,1) exactly like template_tensor.uniform_() in the reference.
        u = jax.random.uniform(key, (B, C), dtype=jnp.float32)
        args.append(u)
        in_specs.append(blk)

    kernel = functools.partial(_gumbel_softmax_kernel,
                               training=training, hard=hard)

    return pl.pallas_call(
        kernel,
        out_shape=jax.ShapeDtypeStruct((B, C), logits.dtype),
        grid_spec=pltpu.PrefetchScalarGridSpec(
            num_scalar_prefetch=0,
            grid=grid,
            in_specs=in_specs,
            out_specs=blk,
        ),
        compiler_params=pltpu.CompilerParams(
            dimension_semantics=("parallel",)),
    )(*args)


if __name__ == "__main__":
    key = jax.random.PRNGKey(0)
    k_logits, k_noise1, k_noise2 = jax.random.split(key, 3)

    B, C = 8, 128  # [batch_size, n_class]
    logits = jax.random.normal(k_logits, (B, C), dtype=jnp.float32)

    # Eval path (module default self.training=False) -> hard one-hot output.
    y_hard = gumbel_softmax_forward(logits, training=False)
    y_hard = jax.block_until_ready(y_hard)

    # Training path, not forced -> soft samples with Gumbel noise.
    y_soft = gumbel_softmax_forward(logits, key=k_noise1, training=True,
                                    force_hard=False)
    y_soft = jax.block_until_ready(y_soft)

    # Training + force_hard -> hard one-hot of the noisy logits.
    y_forced = gumbel_softmax_forward(logits, key=k_noise2, training=True,
                                      force_hard=True)
    y_forced = jax.block_until_ready(y_forced)

    # sanity checks
    assert y_hard.shape == (B, C) and y_soft.shape == (B, C)
    # hard (eval) path: each row is one-hot and matches argmax of the logits
    assert jnp.allclose(jnp.sum(y_hard, axis=-1), 1.0)
    assert jnp.all(jnp.argmax(y_hard, axis=-1) == jnp.argmax(logits, axis=-1))
    # soft path: rows are probability distributions (approx reciprocal -> loose tol)
    assert jnp.allclose(jnp.sum(y_soft, axis=-1), 1.0, atol=1e-2)
    assert jnp.all(y_soft >= 0.0)
    # forced-hard path: still one-hot rows
    assert jnp.allclose(jnp.sum(y_forced, axis=-1), 1.0)

    print("KERNEL_OK")
</pallas_src>

<mosaic_0001>
module attributes {stable_mosaic.version = 11 : i64} {
  func.func @_gumbel_softmax_kernel(%arg0: i32, %arg1: memref<8x128xf32, #tpu.memory_space<vmem>>, %arg2: memref<8x128xf32, #tpu.memory_space<vmem>>) attributes {dimension_semantics = [#tpu.dimension_semantics<parallel>], iteration_bounds = array<i64: 1>, scalar_prefetch = 0 : i64, scratch_operands = 0 : i64, tpu.core_type = #tpu.core_type<tc>, window_params = [{transform_indices = @transform_0, window_bounds = array<i64: 8, 128>}, {transform_indices = @transform_1, window_bounds = array<i64: 8, 128>}]} {
    %c0 = arith.constant 0 : index
    %c0_0 = arith.constant 0 : index
    %0 = vector.load %arg1[%c0, %c0_0] : memref<8x128xf32, #tpu.memory_space<vmem>>, vector<8x128xf32>
    %1 = tpu.iota {dimensions = array<i32: 1>} : vector<8x128xi32>
    %cst = arith.constant dense<0xFF800000> : vector<8xf32>
    %2 = vector.multi_reduction <maximumf>, %0, %cst [1] : vector<8x128xf32> to vector<8xf32>
    %3 = vector.shape_cast %2 : vector<8xf32> to vector<8x1xf32>
    %4 = vector.broadcast %3 : vector<8x1xf32> to vector<8x128xf32>
    %5 = arith.cmpf oeq, %0, %4 : vector<8x128xf32>
    %c128_i32 = arith.constant 128 : i32
    %6 = vector.broadcast %c128_i32 : i32 to vector<8x128xi32>
    %7 = arith.select %5, %1, %6 : vector<8x128xi1>, vector<8x128xi32>
    %cst_1 = arith.constant dense<2147483647> : vector<8xi32>
    %8 = vector.multi_reduction <minsi>, %7, %cst_1 [1] : vector<8x128xi32> to vector<8xi32>
    %9 = vector.shape_cast %8 : vector<8xi32> to vector<8x1xi32>
    %10 = vector.broadcast %9 : vector<8x1xi32> to vector<8x128xi32>
    %11 = arith.cmpi eq, %1, %10 : vector<8x128xi32>
    %cst_2 = arith.constant 1.000000e+00 : f32
    %cst_3 = arith.constant 0.000000e+00 : f32
    %12 = vector.broadcast %cst_2 : f32 to vector<8x128xf32>
    %13 = vector.broadcast %cst_3 : f32 to vector<8x128xf32>
    %14 = arith.select %11, %12, %13 : vector<8x128xi1>, vector<8x128xf32>
    %c0_4 = arith.constant 0 : index
    %c0_5 = arith.constant 0 : index
    %15 = vector.load %arg2[%c0_4, %c0_5] : memref<8x128xf32, #tpu.memory_space<vmem>>, vector<8x128xf32>
    tpu.vector_store %arg2[%c0_4, %c0_5], %14 {strides = array<i32>} : memref<8x128xf32, #tpu.memory_space<vmem>>, vector<8x128xf32>,
    return
  }
  func.func @transform_0(%arg0: i32) -> (i32, i32) {
    %c0_i32 = arith.constant 0 : i32
    %c0_i32_0 = arith.constant 0 : i32
    return %arg0, %c0_i32 : i32, i32
  }
  func.func @transform_1(%arg0: i32) -> (i32, i32) {
    %c0_i32 = arith.constant 0 : i32
    %c0_i32_0 = arith.constant 0 : i32
    return %arg0, %c0_i32 : i32, i32
  }
}

</mosaic_0001>

<bundles_post_ra>
// kernel: tpu_custom_call.1
= control target key start
LH: loop header
LB: loop body
LE: loop exit
PB: predicated region body
PF: predicated region fallthrough
CT: control target
= control target key end

     0   :  { %6 = vsyncpa [#allocation3], 0  ;;  %s148_s0 = inlined_call_operand.hbm [shape: f32[8,128], index: 0, kind: input, shape index: {}]   ;;  %s149_s1 = inlined_call_operand.hbm [shape: f32[8,128], index: 1, kind: output, shape index: {}]  }
   0x1   :  { %7 = vsyncpa [#allocation4], 0  ;;  %s111_s6 = smov [#allocation2]   ;;  %s63_s10 = scalar_lea.hbm %s148_s0, 128 }
   0x2   :  { %s14_s7 = sshll.u32 %s111_s6, 4  ;;  %p64_p0 = scmp.ne.s32.totalorder %s148_s0, %s63_s10  ;;  %s15_s7 = int_to_ptr.vmem [resolvable:$true] %s14_s7 }
   0x3   :  { %p67_p1 = scmp.lt.u32.totalorder %s63_s10, %s148_s0 }
   0x5   :  { %p69_p2 = pnand %p67_p1, %p64_p0 }
   0x7   :  { %72 = shalt.err (!%p69_p2)
}
   0x8   :  { %s73_s15 = scalar_lea.vmem %s15_s7, 128  ;;  %p78_p4 = scmp.lt.s32.totalorder %s15_s7, %s15_s7 }
   0x9   :  { %p74_p3 = scmp.ne.s32.totalorder %s15_s7, %s73_s15  ;;  %p79_p5 = scmp.lt.s32.totalorder %s73_s15, %s73_s15 }
   0xb   :  { %p80_p6 = por %p79_p5, %p78_p4 }
   0xd   :  { %p81_p7 = pnand %p80_p6, %p74_p3 }
   0xf   :  { %84 = shalt.err (!%p81_p7)
}
  0x10   :  { %17 = dma.hbm_to_vmem [thread:$0]  %s148_s0, 128, %s15_s7, [#allocation3]  }
  0x11   :  { %107 = dma.done.wait [#allocation3], 128  }
  0x12   :  { %108 = vsyncadd [#allocation3], 4294967168  ;;  %v21_v0 = vld [vmem:[#allocation2] sm:$0xff]  ;;  %v22_v1 = vlaneseq  ;;  %s112_s0 = smov [#allocation5]   ;;  %v113_v16 = vmov 0.0  }
  0x13   :  { %24 = vmax.xlane.f32.xlu0 %v21_v0  ;;  %s51_s18 = sshll.u32 %s112_s0, 4  ;;  %s52_s18 = int_to_ptr.vmem [resolvable:$true] %s51_s18 }
  0x14   :  { %v23_v2 = vand.u32 127, %v22_v1  ;;  %s85_s19 = scalar_lea.vmem %s52_s18, 128  ;;  %p90_p9 = scmp.lt.s32.totalorder %s52_s18, %s52_s18 }
  0x15   :  { %p86_p8 = scmp.ne.s32.totalorder %s52_s18, %s85_s19  ;;  %p91_p10 = scmp.lt.s32.totalorder %s85_s19, %s85_s19 }
  0x17   :  { %p92_p11 = por %p91_p10, %p90_p9 }
  0x19   :  { %p93_p12 = pnand %p92_p11, %p86_p8 }
  0xa0   :  { %v25_v3 = vpop.xlane.xlu0 %24 }
  0xa1   :  { %vm26_vm0 = vcmp.eq.f32.partialorder %v21_v0, %v25_v3 }
  0xa2   :  { %v27_v4 = vsel %vm26_vm0, %v23_v2, 128 }
  0xa3   :  { %v29_v5 = vshra.s32 %v27_v4, 16  ;;  %v28_v7 = vand.u32 65535, %v27_v4 }
  0xa5   :  { %v31_v6 = vcvt.s32.f32 %v29_v5  ;;  %v30_v9 = vcvt.s32.f32 %v28_v7 }
  0xa7   :  { %32 = vmin.xlane.f32.xlu0 %v31_v6 }
 0x134   :  { %v33_v8 = vpop.xlane.xlu0 %32 }
 0x135   :  { %vm34_vm1 = vcmp.eq.f32.partialorder %v31_v6, %v33_v8  ;;  %v39_v11 = vcvt.f32.s32 %v33_v8 }
 0x136   :  { %v35_v10 = vsel %vm34_vm1, %v30_v9, inf }
 0x137   :  { %36 = vmin.xlane.f32.xlu1 %v35_v10  ;;  %v40_v13 = vshll.u32 %v39_v11, 16 }
 0x1c4   :  { %v37_v12 = vpop.xlane.xlu1 %36 }
 0x1c5   :  { %v38_v14 = vcvt.f32.s32 %v37_v12 }
 0x1c7   :  { %v41_v15 = vadd.s32 %v40_v13, %v38_v14 }
 0x1c9   :  { %vm42_vm2 = vcmp.eq.s32.totalorder %v23_v2, %v41_v15 }
 0x1ca   :  { %v43_v17 = vsel %vm42_vm2, 1.0, %v113_v16 }
 0x1cb   :  { %44 = vst [vmem:[#allocation5] sm:$0xff] %v43_v17 }
 0x1cc   :  { %96 = shalt.err (!%p93_p12)
}
 0x1cd   :  { %s97_s22 = scalar_lea.hbm %s149_s1, 128 }
 0x1ce   :  { %p98_p13 = scmp.ne.s32.totalorder %s149_s1, %s97_s22  ;;  %p101_p0 = scmp.lt.u32.totalorder %s97_s22, %s149_s1 }
 0x1d0   :  { %p103_p1 = pnand %p101_p0, %p98_p13 }
 0x1d2   :  { %106 = shalt.err (!%p103_p1)
}
 0x1d3   :  { %54 = dma.vmem_to_hbm [thread:$0]  %s52_s18, 128, %s149_s1, [#allocation4]  }
 0x1d4   :  { %109 = dma.done.wait [#allocation4], 128  }
 0x1d5   :  { %110 = vsyncadd [#allocation4], 4294967168 }
 0x1d6   :  { %58 = vsyncpa [#allocation3], 1 }
 0x1d7   :  { %59 = vsyncpa [#allocation4], 1 }

</bundles_post_ra>
